<compile_context>
chip_gen: v7x
topology: tpu7x:2x2x1
jax: 0.10.0
libtpu: 0.0.40
codegen_flags: <defaults>
</compile_context>

<pallas_src>
import functools
import math

import jax
import jax.numpy as jnp
from jax import lax
from jax.experimental import pallas as pl
from jax.experimental.pallas import tpu as pltpu

RMS_EPS = 1e-4                 # nn.RMSNorm(..., eps=0.0001)
ACT_DTYPE = jnp.bfloat16       # activation dtype read by the kernel (HBM read bytes)
OUT_DTYPE = jnp.bfloat16       # kernel output dtype (HBM write bytes)


# ---------------------------------------------------------------------------
# Pallas kernel: fused (2x2 merge recombination) matmul + RMSNorm
# ---------------------------------------------------------------------------
def _patch_merging_kernel(x_ref, w_ref, g_ref, o_ref, *, wh, eps):
    # x_ref : (tp, 2*Wh, 2C)  bf16 -- contiguous slab of tp image-row pairs
    # w_ref : (2, 2C, D)      bf16 -- stacked [W_even, W_odd] pre-permuted weights
    # g_ref : (1, D)          f32  -- RMSNorm affine weight
    # o_ref : (tp*Wh, D)
    tp = x_ref.shape[0]
    c2 = x_ref.shape[2]
    m = tp * wh
    # Even / odd image-row slabs: static, sublane-aligned slices of the block.
    # The (tp, Wh) -> (m,) collapse is layout-free when Wh % 8 == 0 (demo: Wh=8);
    # for Wh % 8 != 0 (e.g. SWIN W=56) the compiler inserts a relayout copy.
    xe = x_ref[:, :wh, :].reshape(m, c2)
    xo = x_ref[:, wh:, :].reshape(m, c2)
    # merged @ W  ==  xe @ W_even + xo @ W_odd   (f32 accumulation on the MXU)
    y = jnp.dot(xe, w_ref[0], preferred_element_type=jnp.float32)
    y = y + jnp.dot(xo, w_ref[1], preferred_element_type=jnp.float32)
    # RMSNorm over the feature dim (f32)
    ms = jnp.mean(y * y, axis=-1, keepdims=True)
    y = y * lax.rsqrt(ms + eps) * g_ref[...]
    o_ref[...] = y.astype(o_ref.dtype)


# ---------------------------------------------------------------------------
# Helpers
# ---------------------------------------------------------------------------
def _resolve_hw(L, input_resolution):
    if input_resolution is not None:
        H, W = input_resolution
        assert L == H * W, f"L ({L}) != H*W ({H * W})"
    else:
        r = math.isqrt(L)
        if r * r != L:
            raise ValueError(f"L ({L}) is not a perfect square; pass input_resolution.")
        H = W = r
    assert H % 2 == 0 and W % 2 == 0, f"H ({H}) and W ({W}) must be even."
    return H, W


def _vmem_capacity_bytes():
    """Chip-aware VMEM capacity (128 MiB v5e/v6e, 64 MiB per TC on v7x)."""
    try:
        return int(pltpu.get_tpu_info().vmem_capacity_bytes)
    except Exception:
        return 64 << 20   # conservative fallback (v7x per-TensorCore VMEM)


def _pick_tp(P, Wh, C, budget_bytes):
    """Largest legal row-pair tile whose per-step footprint (double-buffered
    input/output blocks + weights + in-kernel temporaries) fits the budget,
    while keeping >= 2 grid steps so both v7x TensorCores get work."""
    D = 2 * C
    in_b = jnp.dtype(ACT_DTYPE).itemsize
    out_b = jnp.dtype(OUT_DTYPE).itemsize

    def footprint(tp):
        m = tp * Wh
        blk_in = 2 * (tp * 2 * Wh * 2 * C) * in_b      # input block, double-buffered
        blk_out = 2 * (m * D) * out_b                  # output block, double-buffered
        wts = 2 * (2 * 2 * C * D) * 2 + 2 * D * 4      # stacked bf16 weights + gamma
        temps = m * D * 8 + 2 * m * 2 * C * 2          # f32 y / y*y + xe/xo copies
        return blk_in + blk_out + wts + temps

    def legal(tp):
        # output block second-to-last dim must be a multiple of 8 (or the full dim)
        return (tp * Wh) % 8 == 0 or tp == P

    max_tp = P if P < 2 else max(1, (P + 1) // 2)      # guarantee >= 2 grid steps
    cands = [tp for tp in range(1, max_tp + 1)
             if legal(tp) and footprint(tp) <= budget_bytes]
    if not cands:
        small = [tp for tp in range(1, P + 1) if legal(tp)]
        return small[0] if small else P
    divs = [tp for tp in cands if P % tp == 0]         # prefer no ragged last block
    return max(divs) if divs else max(cands)


# ---------------------------------------------------------------------------
# Parameter init (deterministic, PyTorch-like) + weight pre-permutation
# ---------------------------------------------------------------------------
def init_patch_merging(key, c1):
    d_in, d_out = 4 * c1, 2 * c1
    kw, kg = jax.random.split(key)
    bound = 1.0 / math.sqrt(d_in)
    # nn.Linear weight layout: (out_features, in_features), y = x @ W.T
    w_lin = jax.random.uniform(kw, (d_out, d_in), jnp.float32, -bound, bound)
    # nn.RMSNorm affine weight (ones at init; perturbed here for a meaningful test)
    gamma = 1.0 + 0.1 * jax.random.normal(kg, (d_out,), jnp.float32)

    # Pre-permute the reduction weight rows for the even/odd image-row slabs:
    #   even slab features = [pixel(2h,2w)   (=x0) | pixel(2h,2w+1)   (=x2)]
    #   odd  slab features = [pixel(2h+1,2w) (=x1) | pixel(2h+1,2w+1) (=x3)]
    wt, c = w_lin.T, c1                                               # (4C, D): [x0|x1|x2|x3]
    w_even = jnp.concatenate([wt[0:c], wt[2 * c:3 * c]], axis=0)      # (2C, D)
    w_odd = jnp.concatenate([wt[c:2 * c], wt[3 * c:4 * c]], axis=0)   # (2C, D)
    return {
        "w_lin": w_lin,                                               # f32, pure-JAX reference
        "gamma": gamma,                                               # f32
        "w_stack": jnp.stack([w_even, w_odd]).astype(jnp.bfloat16),   # (2, 2C, D) bf16
    }


# ---------------------------------------------------------------------------
# Forward (Pallas) and pure-JAX reference
# ---------------------------------------------------------------------------
def patch_merging_forward(params, x, input_resolution=None):
    B, L, C = x.shape
    H, W = _resolve_hw(L, input_resolution)
    P, Wh, D = B * (H // 2), W // 2, 2 * C

    # Free view reshape (no data movement): row-pair p = b*(H/2)+h'; dim-1 rows
    # [0, Wh) are the even image row, rows [Wh, 2Wh) the odd image row.
    x3 = x.reshape(P, 2 * Wh, 2 * C)
    if x3.dtype != ACT_DTYPE:
        # Ideally the upstream layer emits bf16 directly; cast only if needed.
        x3 = x3.astype(ACT_DTYPE)

    cap = _vmem_capacity_bytes()
    budget = min(int(cap * 0.55), 72 << 20)         # chip-aware tile budget
    vmem_limit = min(int(cap * 0.85), 112 << 20)    # raise scoped-VMEM limit to match
    tp = _pick_tp(P, Wh, C, budget)
    grid = (pl.cdiv(P, tp),)

    kern = functools.partial(_patch_merging_kernel, wh=Wh, eps=RMS_EPS)
    out2d = pl.pallas_call(
        kern,
        out_shape=jax.ShapeDtypeStruct((P * Wh, D), OUT_DTYPE),
        grid_spec=pl.GridSpec(
            grid=grid,
            in_specs=[
                # one fully contiguous activation DMA per grid step
                pl.BlockSpec((tp, 2 * Wh, 2 * C), lambda i: (i, 0, 0)),
                # stacked [W_even, W_odd] constant (fetched with a constant index map)
                pl.BlockSpec((2, 2 * C, D), lambda i: (0, 0, 0)),
                # RMSNorm gamma
                pl.BlockSpec((1, D), lambda i: (0, 0)),
            ],
            out_specs=pl.BlockSpec((tp * Wh, D), lambda i: (i, 0)),
        ),
        compiler_params=pltpu.CompilerParams(
            dimension_semantics=("parallel",),
            vmem_limit_bytes=vmem_limit,
        ),
    )(x3, params["w_stack"], params["gamma"][None, :])

    return out2d.reshape(B, (H // 2) * Wh, D)


def patch_merging_ref(params, x, input_resolution=None):
    B, L, C = x.shape
    H, W = _resolve_hw(L, input_resolution)
    xr = x.reshape(B, H, W, C).astype(jnp.float32)
    x0 = xr[:, 0::2, 0::2, :]
    x1 = xr[:, 1::2, 0::2, :]
    x2 = xr[:, 0::2, 1::2, :]
    x3 = xr[:, 1::2, 1::2, :]
    merged = jnp.concatenate([x0, x1, x2, x3], axis=-1).reshape(B, -1, 4 * C)
    y = merged @ params["w_lin"].T
    ms = jnp.mean(y * y, axis=-1, keepdims=True)
    return y * lax.rsqrt(ms + RMS_EPS) * params["gamma"]


if __name__ == "__main__":
    key = jax.random.PRNGKey(0)
    kp, kx = jax.random.split(key)
    # Small but lane-friendly: B=2, H=W=16 -> L=256; C=64 so 2C=128 (lane-dense output).
    B, H, W, C = 2, 16, 16, 64
    params = init_patch_merging(kp, C)
    # Activations in bf16 (as an upstream bf16 layer would emit them).
    x = jax.random.normal(kx, (B, H * W, C), jnp.bfloat16)

    out = jax.block_until_ready(patch_merging_forward(params, x))
    ref = patch_merging_ref(params, x)

    assert out.shape == (B, (H // 2) * (W // 2), 2 * C), (out.shape,)
    out32 = out.astype(jnp.float32)
    # bf16 weights + bf16 output vs f32 reference -> combined rel/abs tolerance.
    err = float(jnp.max(jnp.abs(out32 - ref) / (1.0 + jnp.abs(ref))))
    if err > 5e-2:
        raise AssertionError(f"Pallas output mismatch vs reference, rel err = {err}")
    print("KERNEL_OK")
</pallas_src>

<mosaic_0001>
module attributes {stable_mosaic.version = 11 : i64} {
  func.func @_patch_merging_kernel(%arg0: i32, %arg1: memref<8x16x128xbf16, #tpu.memory_space<vmem>>, %arg2: memref<2x128x128xbf16, #tpu.memory_space<vmem>>, %arg3: memref<1x128xf32, #tpu.memory_space<vmem>>, %arg4: memref<64x128xbf16, #tpu.memory_space<vmem>>) attributes {dimension_semantics = [#tpu.dimension_semantics<parallel>], iteration_bounds = array<i64: 2>, scalar_prefetch = 0 : i64, scratch_operands = 0 : i64, tpu.core_type = #tpu.core_type<tc>, window_params = [{transform_indices = @transform_0, window_bounds = array<i64: 8, 16, 128>}, {pipeline_mode = #tpu.pipeline_mode<synchronous>, transform_indices = @transform_1, window_bounds = array<i64: 2, 128, 128>}, {pipeline_mode = #tpu.pipeline_mode<synchronous>, transform_indices = @transform_2, window_bounds = array<i64: 1, 128>}, {transform_indices = @transform_3, window_bounds = array<i64: 64, 128>}]} {
    %c0 = arith.constant 0 : index
    %c0_0 = arith.constant 0 : index
    %c0_1 = arith.constant 0 : index
    %0 = vector.load %arg1[%c0, %c0_0, %c0_1] : memref<8x16x128xbf16, #tpu.memory_space<vmem>>, vector<8x8x128xbf16>
    %1 = vector.shape_cast %0 : vector<8x8x128xbf16> to vector<64x128xbf16>
    %c0_2 = arith.constant 0 : index
    %c8 = arith.constant 8 : index
    %c0_3 = arith.constant 0 : index
    %2 = vector.load %arg1[%c0_2, %c8, %c0_3] : memref<8x16x128xbf16, #tpu.memory_space<vmem>>, vector<8x8x128xbf16>
    %3 = vector.shape_cast %2 : vector<8x8x128xbf16> to vector<64x128xbf16>
    %c0_4 = arith.constant 0 : index
    %c0_5 = arith.constant 0 : index
    %c0_6 = arith.constant 0 : index
    %4 = vector.load %arg2[%c0_4, %c0_5, %c0_6] : memref<2x128x128xbf16, #tpu.memory_space<vmem>>, vector<1x128x128xbf16>
    %5 = vector.shape_cast %4 : vector<1x128x128xbf16> to vector<128x128xbf16>
    %cst = arith.constant dense<0.000000e+00> : vector<64x128xf32>
    %6 = tpu.matmul %1, %5, %cst {dimension_numbers = #tpu.dot_dimension_numbers<[1], [0], [0], [1], [0, 0, 1, 1], [], []>} : vector<64x128xbf16>, vector<128x128xbf16>, vector<64x128xf32> -> vector<64x128xf32>
    %c1 = arith.constant 1 : index
    %c0_7 = arith.constant 0 : index
    %c0_8 = arith.constant 0 : index
    %7 = vector.load %arg2[%c1, %c0_7, %c0_8] : memref<2x128x128xbf16, #tpu.memory_space<vmem>>, vector<1x128x128xbf16>
    %8 = vector.shape_cast %7 : vector<1x128x128xbf16> to vector<128x128xbf16>
    %cst_9 = arith.constant dense<0.000000e+00> : vector<64x128xf32>
    %9 = tpu.matmul %3, %8, %cst_9 {dimension_numbers = #tpu.dot_dimension_numbers<[1], [0], [0], [1], [0, 0, 1, 1], [], []>} : vector<64x128xbf16>, vector<128x128xbf16>, vector<64x128xf32> -> vector<64x128xf32>
    %10 = arith.addf %6, %9 : vector<64x128xf32>
    %11 = arith.mulf %10, %10 : vector<64x128xf32>
    %cst_10 = arith.constant dense<0.000000e+00> : vector<64xf32>
    %12 = vector.multi_reduction <add>, %11, %cst_10 [1] : vector<64x128xf32> to vector<64xf32>
    %13 = vector.shape_cast %12 : vector<64xf32> to vector<64x1xf32>
    %cst_11 = arith.constant 1.280000e+02 : f32
    %14 = vector.broadcast %cst_11 : f32 to vector<64x1xf32>
    %15 = arith.divf %13, %14 : vector<64x1xf32>
    %cst_12 = arith.constant 9.99999974E-5 : f32
    %16 = vector.broadcast %cst_12 : f32 to vector<64x1xf32>
    %17 = arith.addf %15, %16 : vector<64x1xf32>
    %18 = math.rsqrt %17 : vector<64x1xf32>
    %19 = vector.broadcast %18 : vector<64x1xf32> to vector<64x128xf32>
    %20 = arith.mulf %10, %19 : vector<64x128xf32>
    %c0_13 = arith.constant 0 : index
    %c0_14 = arith.constant 0 : index
    %21 = vector.load %arg3[%c0_13, %c0_14] : memref<1x128xf32, #tpu.memory_space<vmem>>, vector<1x128xf32>
    %22 = vector.broadcast %21 : vector<1x128xf32> to vector<64x128xf32>
    %23 = arith.mulf %20, %22 : vector<64x128xf32>
    %24 = arith.truncf %23 : vector<64x128xf32> to vector<64x128xbf16>
    %c0_15 = arith.constant 0 : index
    %c0_16 = arith.constant 0 : index
    %25 = vector.load %arg4[%c0_15, %c0_16] : memref<64x128xbf16, #tpu.memory_space<vmem>>, vector<64x128xbf16>
    tpu.vector_store %arg4[%c0_15, %c0_16], %24 {strides = array<i32>} : memref<64x128xbf16, #tpu.memory_space<vmem>>, vector<64x128xbf16>,
    return
  }
  func.func @transform_0(%arg0: i32) -> (i32, i32, i32) {
    %c0_i32 = arith.constant 0 : i32
    %c0_i32_0 = arith.constant 0 : i32
    %c0_i32_1 = arith.constant 0 : i32
    return %arg0, %c0_i32, %c0_i32_0 : i32, i32, i32
  }
  func.func @transform_1(%arg0: i32) -> (i32, i32, i32) {
    %c0_i32 = arith.constant 0 : i32
    %c0_i32_0 = arith.constant 0 : i32
    %c0_i32_1 = arith.constant 0 : i32
    %c0_i32_2 = arith.constant 0 : i32
    return %c0_i32, %c0_i32_0, %c0_i32_1 : i32, i32, i32
  }
  func.func @transform_2(%arg0: i32) -> (i32, i32) {
    %c0_i32 = arith.constant 0 : i32
    %c0_i32_0 = arith.constant 0 : i32
    %c0_i32_1 = arith.constant 0 : i32
    return %c0_i32, %c0_i32_0 : i32, i32
  }
  func.func @transform_3(%arg0: i32) -> (i32, i32) {
    %c0_i32 = arith.constant 0 : i32
    %c0_i32_0 = arith.constant 0 : i32
    return %arg0, %c0_i32 : i32, i32
  }
}

</mosaic_0001>

<bundles_post_ra>
// kernel: tpu_custom_call.1
= control target key start
LH: loop header
LB: loop body
LE: loop exit
PB: predicated region body
PF: predicated region fallthrough
CT: control target
= control target key end

     0   :  { %8 = vsyncpa [#allocation3], 0  ;;  %s1423_s0 = inlined_call_operand.hbm [shape: bf16[16,16,128], index: 0, kind: input, shape index: {}]   ;;  %s1424_s1 = inlined_call_operand.hbm [shape: bf16[2,128,128], index: 1, kind: input, shape index: {}]   ;;  %s1425_s2 = inlined_call_operand.vmem [shape: f32[1,128], index: 2, kind: input, shape index: {}]   ;;  %s1426_s3 = inlined_call_operand.hbm [shape: bf16[128,128], index: 3, kind: output, shape index: {}]  }
   0x1   :  { %10 = vsyncpa [#allocation3 + $0x1], 0 }
   0x2   :  { %11 = vsyncpa [#allocation6], 0 }
   0x3   :  { %12 = vsyncpa [#allocation4], 0 }
   0x4   :  { %14 = vsyncpa [#allocation4 + $0x1], 0  ;;  %s1162_s12 = smov 0   ;;  %s1164_s13 = smov 0  }
   0x5   :  { %s1166_s14 = smov 0   ;;  %s1168_s15 = smov 0  }
   0x6 LB: > { %s1183_s16 = sadd.s32 4294967295, %s1133_s15   ;;  %s740_s17 = sadd.s32 4294967294, %s1133_s15   ;;  %s1133_s15 = sphi %s1168_s15, %s1446_s15   ;;  %s1129_s14 = sphi %s1166_s14, %s1445_s14   ;;  %s1125_s13 = sphi %s1164_s13, %s1444_s13   ;;  %s1121_s12 = sphi %s1162_s12, %s1443_s12  }
   0x7   : > { %p40_p0 = scmp.ne.s32.totalorder %s1125_s13, %s1121_s12  ;;  %p1427_p1 = scmp.eq.s32.totalorder %s1183_s16, 0 }
   0x8   : > { %p112_p3 = scmp.eq.s32.totalorder %s740_s17, 1  ;;  %p741_p5 = scmp.ge.s32.totalorder %s1133_s15, 1 }
   0x9   : > { %p1192_p4 = por %p1427_p1, %p40_p0  ;;  %p119_p7 = scmp.lt.s32.totalorder %s1133_s15, 3 }
   0xa   : > { %p1197_p6 = por %p112_p3, %p40_p0  ;;  %s1135_s21 = smov [#allocation5]  }
   0xb   : > { %s1430_s18 = scalar_select %p1192_p4, 1, 0 }
   0xc   : > { %s1431_s19 = scalar_select %p1197_p6, 1, 0 }
   0xd   : > { %p1202_p8 = pnand %p741_p5, %p119_p7  ;;  %s131_s22 = sshll.u32 %s1135_s21, 4  ;;  %s1206_s22 = int_to_ptr.vmem [resolvable:$true] %s131_s22 }
   0xe   : > { %s1218_s24 = sadd.s32 1, %s1133_s15   ;;  %s27_s25 = sadd.s32 1, %s1129_s14 }
   0xf   : > { %s1432_s20 = scalar_select %p1202_p8, 1, 0 }
  0x10   : > { %p912_p9 = pneg %p1202_p8  ;;  %s24_s26 = ssub.s32 %s1133_s15, %s1218_s24 }
  0x11   : > { %s1005_s29 = scalar_lea.hbm %s1424_s1, 2048 }
  0x12   : > { %p1213_p11 = pnand %p912_p9, %p1427_p1  ;;  %p1006_p12 = scmp.ne.s32.totalorder %s1424_s1, %s1005_s29 }
  0x13   : > { %p1012_p5 = scmp.lt.u32.totalorder %s1005_s29, %s1424_s1 }
  0x14   : > { %p1007_p13 = pneg %p1213_p11 }
  0x16   : > { %p1008_p0 = pnand %p1007_p13, %p1006_p12 }
  0x18   : > { %p1009_p3 = pneg %p1008_p0 }
  0x1a   : > { %p1014_p7 = pnand %p1012_p5, %p1009_p3 }
  0x1c   : > { %1017 = shalt.err (!%p1014_p7)
}
  0x1d   : > { %s1018_s7 = scalar_lea.vmem %s1206_s22, 2048  ;;  %p1026_p2 = scmp.lt.s32.totalorder %s1206_s22, %s1206_s22 }
  0x1e   : > { %p1019_p9 = scmp.ne.s32.totalorder %s1206_s22, %s1018_s7  ;;  %p1027_p6 = scmp.lt.s32.totalorder %s1018_s7, %s1018_s7 }
  0x20   : > { %p1021_p10 = pnand %p1019_p9, %p1007_p13  ;;  %p1028_p4 = por %p1027_p6, %p1026_p2 }
  0x22   : > { %p1022_p1 = pneg %p1021_p10 }
  0x24   : > { %p1029_p8 = pnand %p1028_p4, %p1022_p1 }
  0x26   : > { %1032 = shalt.err (!%p1029_p8)
}
  0x27   : > { %s1136_s8 = smov 64   ;;  %s1137_s9 = smov 4  }
  0x28   : > { %915 = dma.hbm_to_vmem [thread:$0]  (!%p1213_p11), %s1424_s1, 2048, %s1206_s22, [#allocation6], %s1136_s8, %s1136_s8, %s1137_s9  }
  0x29   : > { %p25_p1 = scmp.eq.s32.totalorder %s24_s26, 0  ;;  %p34_p2 = scmp.ne.s32.totalorder %s1129_s14, %s1125_s13 }
  0x2a   : > { %p35_p4 = scmp.eq.s32.totalorder %s1133_s15, 0  ;;  %p925_p6 = scmp.lt.s32.totalorder %s1133_s15, 2 }
  0x2b   : > { %s1252_s17 = scalar_select %p25_p1, %s1129_s14, %s27_s25  }
  0x2c   : > { %p36_p8 = por %p35_p4, %p34_p2  ;;  %p1434_p10 = scmp.eq.s32.totalorder %s1183_s16, 1 }
  0x2d   : > { %s148_s23 = sand.u32 1, %s1129_s14   ;;  %s791_s27 = sshll.u32 %s1133_s15, 10 }
  0x2e   : > { %p1256_p12 = por %p1434_p10, %p34_p2  ;;  %s744_s28 = sshll.u32 %s148_s23, 6 }
  0x2f   : > { %s1265_s4 = scalar_lea.hbm %s1423_s0, %s791_s27  ;;  %s152_s22 = scalar_lea.vmem [#allocation2], %s744_s28 }
  0x30   : > { %s160_s25 = sshll.u32 %s152_s22, 4  ;;  %p1267_p11 = pnand %p925_p6, %p36_p8  ;;  %s1271_s25 = int_to_ptr.vmem [resolvable:$true] %s160_s25 }
  0x31   : > { %s1273_s5 = scalar_lea.sflag [#allocation3], %s148_s23  ;;  %s1033_s6 = scalar_lea.hbm %s1265_s4, 1024 }
  0x32   : > { %p1034_p13 = scmp.ne.s32.totalorder %s1265_s4, %s1033_s6  ;;  %p1035_p0 = pneg %p1267_p11 }
  0x33   : > { %s1038_s11 = scalar_lea.hbm %s1423_s0, 2048  ;;  %p1039_p7 = scmp.lt.u32.totalorder %s1265_s4, %s1423_s0 }
  0x34   : > { %p1036_p3 = pnand %p1035_p0, %p1034_p13  ;;  %p1040_p9 = scmp.lt.u32.totalorder %s1038_s11, %s1033_s6 }
  0x35   : > { %p1042_p2 = scmp.lt.u32.totalorder %s1033_s6, %s1265_s4 }
  0x36   : > { %p1037_p5 = pneg %p1036_p3  ;;  %p1041_p1 = por %p1040_p9, %p1039_p7 }
  0x38   : > { %p1043_p4 = por %p1042_p2, %p1041_p1 }
  0x3a   : > { %p1044_p6 = pnand %p1043_p4, %p1037_p5 }
  0x3c   : > { %1047 = shalt.err (!%p1044_p6)
}
  0x3d   : > { %s1048_s23 = scalar_lea.vmem %s1271_s25, 1024  ;;  %s1138_s29 = smov [#allocation2]  }
  0x3e   : > { %p1049_p8 = scmp.ne.s32.totalorder %s1271_s25, %s1048_s23  ;;  %s1053_s30 = sshll.u32 %s1138_s29, 4  ;;  %s1054_s30 = int_to_ptr.vmem [resolvable:$false] %s1053_s30 }
  0x3f   : > { %s1055_s22 = scalar_lea.vmem %s1054_s30, 2048  ;;  %p1056_p3 = scmp.lt.s32.totalorder %s1271_s25, %s1054_s30 }
  0x40   : > { %p1051_p10 = pnand %p1049_p8, %p1035_p0  ;;  %p1057_p7 = scmp.lt.s32.totalorder %s1055_s22, %s1048_s23 }
  0x42   : > { %p1052_p13 = pneg %p1051_p10  ;;  %p1058_p9 = por %p1057_p7, %p1056_p3 }
  0x44   : > { %p1059_p1 = pnand %p1058_p9, %p1052_p13 }
  0x46   : > { %1062 = shalt.err (!%p1059_p1)
}
  0x47   : > { %919 = dma.hbm_to_vmem [thread:$0]  (!%p1267_p11), %s1265_s4, 1024, %s1271_s25, %s1273_s5, %s1136_s8, %s1136_s8, %s1137_s9  }
  0x48   : > { %p1437_p0 = scmp.ne.s32.totalorder %s1432_s20, 0 }
  0x49   : > { %s1307_s6 = sand.u32 (!%p1437_p0), 1, %s1125_s13   ;;  %p1438_p5 = scmp.ne.s32.totalorder (!%p1437_p0), %s1430_s18, 0 }
  0x4a   : > { %172 = sbr.rel (%p1437_p0) target bundleno = 528 (0x210), region = 32  ;;  %s749_s7 = sshll.u32 (!%p1437_p0), %s1307_s6, 6 }
  0x4b   : > { %s175_s10 = scalar_lea.sflag (!%p1437_p0), [#allocation3], %s1307_s6  ;;  %s1311_s11 = scalar_lea.vmem (!%p1437_p0), [#allocation2], %s749_s7 }
  0x51   : > { %1108 = dma.done.wait (%p1438_p5), %s175_s10, 1024  }
  0x52   : > { %1110 = vsyncadd (%p1438_p5), %s175_s10, 4294966272  ;;  %p1439_p11 = scmp.eq.s32.totalorder %s1183_s16, 0 }
  0x54   : > { %1112 = dma.done.wait (%p1439_p11), [#allocation6], 2048   ;;  %p1440_p2 = pmov %p1439_p11 }
  0x55   : > { %v965_v0 = vld [vmem:[#allocation5 + $0x40] sm:$0xff]   ;;  %v967_v2 = vld [vmem:[#allocation5 + $0x48] sm:$0xff]   ;;  %v969_v4 = vld [vmem:[#allocation5 + $0x50] sm:$0xff]   ;;  %s751_s8 = sshll.u32 %s1307_s6, 5  ;;  %s800_s4 = sshll.u32 %s1183_s16, 9 }
  0x56   : > { %1114 = vsyncadd (%p1440_p2), [#allocation6], 4294965248  ;;  %v966_v1 = vld [vmem:[#allocation5] sm:$0xff]   ;;  %848 = vmatprep.subr.bf16.mxu1 %v965_v0  ;;  %v968_v3 = vld [vmem:[#allocation5 + $0x8] sm:$0xff]   ;;  %s204_s9 = scalar_lea.vmem [#allocation7], %s751_s8  ;;  %s1377_s27 = scalar_lea.hbm %s1426_s3, %s800_s4 }
  0x57   : > { %872 = vmatprep.subr.bf16.mxu0 %v966_v1  ;;  %849 = vmatpush3.bf16.msra.mxu1 %v965_v0  ;;  %v970_v5 = vld [vmem:[#allocation5 + $0x10] sm:$0xff]   ;;  %v971_v6 = vld [vmem:[#allocation5 + $0x58] sm:$0xff]   ;;  %v973_v8 = vld [vmem:[#allocation5 + $0x60] sm:$0xff]   ;;  %s657_s25 = sshll.u32 %s204_s9, 4  ;;  %s644_s28 = scalar_lea.sflag [#allocation4], %s1307_s6  ;;  %s1379_s25 = int_to_ptr.vmem [resolvable:$true] %s657_s25 }
  0x58   : > { %873 = vmatpush3.bf16.msra.mxu0 %v966_v1  ;;  %850 = vmatprep.subr.bf16.mxu1 %v967_v2  ;;  %v972_v7 = vld [vmem:[#allocation5 + $0x18] sm:$0xff]   ;;  %v974_v9 = vld [vmem:[#allocation5 + $0x20] sm:$0xff]   ;;  %v975_v10 = vld [vmem:[#allocation5 + $0x68] sm:$0xff]   ;;  %s1063_s23 = scalar_lea.vmem %s1379_s25, 512  ;;  %s1139_s16 = smov [#allocation7]  }
  0x59   : > { %874 = vmatprep.subr.bf16.mxu0 %v968_v3  ;;  %v976_v11 = vld [vmem:[#allocation5 + $0x28] sm:$0xff]   ;;  %v977_v14 = vld [vmem:[#allocation5 + $0x70] sm:$0xff]   ;;  %v979_v16 = vld [vmem:[#allocation5 + $0x78] sm:$0xff]   ;;  %p1064_p4 = scmp.ne.s32.totalorder %s1379_s25, %s1063_s23  ;;  %s1067_s29 = sshll.u32 %s1139_s16, 4  ;;  %s1068_s29 = int_to_ptr.vmem [resolvable:$false] %s1067_s29 }
  0x5a   : > { %v981_v12 = vld [vmem:[%s1311_s11 + $0x4] ss:$8 sps:$4 sm:$0xff]   ;;  %v982_v13 = vld [vmem:[%s1311_s11] ss:$8 sps:$4 sm:$0xff]   ;;  %v978_v15 = vld [vmem:[#allocation5 + $0x30] sm:$0xff]   ;;  %s1069_s30 = scalar_lea.vmem %s1068_s29, 1024  ;;  %p1070_p10 = scmp.lt.s32.totalorder %s1379_s25, %s1068_s29 }
  0x5b   : > { %851 = vmatpush3.bf16.msra.mxu1 %v967_v2  ;;  %864 = vmatprep.mubr.bf16.mxu1 %v981_v12  ;;  %v980_v17 = vld [vmem:[#allocation5 + $0x38] sm:$0xff]   ;;  %v985_v20 = vld [vmem:[%s1311_s11 + $0x24] ss:$8 sps:$4 sm:$0xff]   ;;  %v986_v21 = vld [vmem:[%s1311_s11 + $0x20] ss:$8 sps:$4 sm:$0xff]   ;;  %p1065_p6 = pnand %p1064_p4, %p1256_p12  ;;  %p1071_p13 = scmp.lt.s32.totalorder %s1069_s30, %s1063_s23 }
  0x5c   : > { %875 = vmatpush3.bf16.msra.mxu0 %v968_v3  ;;  %852 = vmatprep.subr.bf16.mxu1 %v969_v4  ;;  %v983_v18 = vld [vmem:[%s1311_s11 + $0x14] ss:$8 sps:$4 sm:$0xff]   ;;  %v984_v19 = vld [vmem:[%s1311_s11 + $0x10] ss:$8 sps:$4 sm:$0xff]  }
  0x5d   : > { %876 = vmatprep.subr.bf16.mxu0 %v970_v5  ;;  %888 = vmatprep.mubr.bf16.mxu0 %v982_v13  ;;  %v987_v22 = vld [vmem:[%s1311_s11 + $0x34] ss:$8 sps:$4 sm:$0xff]   ;;  %v988_v23 = vld [vmem:[%s1311_s11 + $0x30] ss:$8 sps:$4 sm:$0xff]   ;;  %p1066_p8 = pneg %p1065_p6  ;;  %p1072_p3 = por %p1071_p13, %p1070_p10 }
  0x5f   : > { %853 = vmatpush3.bf16.msra.mxu1 %v969_v4  ;;  %p1073_p7 = pnand %p1072_p3, %p1066_p8 }
  0x60   : > { %877 = vmatpush3.bf16.msra.mxu0 %v970_v5  ;;  %854 = vmatprep.subr.bf16.mxu1 %v971_v6 }
  0x61   : > { %878 = vmatprep.subr.bf16.mxu0 %v972_v7 }
  0x63   : > { %855 = vmatpush3.bf16.msra.mxu1 %v971_v6 }
  0x64   : > { %879 = vmatpush3.bf16.msra.mxu0 %v972_v7  ;;  %856 = vmatprep.subr.bf16.mxu1 %v973_v8 }
  0x65   : > { %880 = vmatprep.subr.bf16.mxu0 %v974_v9 }
  0x67   : > { %857 = vmatpush3.bf16.msra.mxu1 %v973_v8 }
  0x68   : > { %881 = vmatpush3.bf16.msra.mxu0 %v974_v9  ;;  %858 = vmatprep.subr.bf16.mxu1 %v975_v10 }
  0x69   : > { %882 = vmatprep.subr.bf16.mxu0 %v976_v11 }
  0x6b   : > { %859 = vmatpush3.bf16.msra.mxu1 %v975_v10 }
  0x6c   : > { %883 = vmatpush3.bf16.msra.mxu0 %v976_v11  ;;  %860 = vmatprep.subr.bf16.mxu1 %v977_v14 }
  0x6d   : > { %884 = vmatprep.subr.bf16.mxu0 %v978_v15 }
  0x6f   : > { %861 = vmatpush3.bf16.msra.mxu1 %v977_v14 }
  0x70   : > { %885 = vmatpush3.bf16.msra.mxu0 %v978_v15  ;;  %862 = vmatprep.subr.bf16.mxu1 %v979_v16 }
  0x71   : > { %886 = vmatprep.subr.bf16.mxu0 %v980_v17 }
  0x73   : > { %863 = vmatpush3.bf16.msra.mxu1 %v979_v16 }
  0x74   : > { %887 = vmatpush3.bf16.msra.mxu0 %v980_v17 }
  0x76   : > { %865 = vmatmul.mubr.bf16.vlgmr.msra.gmra.mrb[0].mxu1 %v983_v18 }
  0x77   : > { %889 = vmatmul.mubr.bf16.vlgmr.msra.gmra.mrb[0].mxu0 %v984_v19  ;;  %868 = vmatprep.mubr.bf16.mxu1 %v985_v20  ;;  %v776_v20 = vld [vmem:[%s1425_s2] ss:$0 sm:$0xff] }
  0x78   : > { %892 = vmatprep.mubr.bf16.mxu0 %v986_v21 }
  0x7e   : > { %869 = vmatmul.mubr.bf16.gmra.mrb[4].mxu1 %v987_v22 }
  0x7f   : > { %893 = vmatmul.mubr.bf16.gmra.mrb[4].mxu0 %v988_v23 }
 0x149   : > { %v866_v24 = vpop.f32.mrb[0].mxu1 }
 0x14a   : > { %v890_v25 = vpop.f32.mrb[0].mxu0  ;;  %v363_v26 = vpop.f32.mrb[1].mxu1 }
 0x14b   : > { %v1329_v27 = vadd.f32 %v890_v25, %v866_v24  ;;  %v500_v28 = vpop.f32.mrb[1].mxu0  ;;  %v867_v29 = vpop.f32.mrb[2].mxu1 }
 0x14c   : > { %v1331_v30 = vadd.f32 %v500_v28, %v363_v26  ;;  %v891_v31 = vpop.f32.mrb[2].mxu0  ;;  %v366_v32 = vpop.f32.mrb[3].mxu1 }
 0x14d   : > { %v1333_v33 = vadd.f32 %v891_v31, %v867_v29  ;;  %v503_v34 = vpop.f32.mrb[3].mxu0  ;;  %v533_v35 = vmul.f32 %v1329_v27, %v1329_v27 }
 0x14e   : > { %v1337_v36 = vadd.f32 %v503_v34, %v366_v32  ;;  %v531_v37 = vmul.f32 %v1331_v30, %v1331_v30 }
 0x14f   : > { %543 = vadd.xlane.f32.xlu1 %v533_v35  ;;  %v534_v39 = vmul.f32 %v1333_v33, %v1333_v33 }
 0x150   : > { %539 = vadd.xlane.f32.xlu0 %v531_v37  ;;  %v532_v42 = vmul.f32 %v1337_v36, %v1337_v36 }
 0x151   : > { %v870_v38 = vpop.f32.mrb[4].mxu1 }
 0x152   : > { %v894_v40 = vpop.f32.mrb[4].mxu0  ;;  %v379_v41 = vpop.f32.mrb[5].mxu1 }
 0x153   : > { %v1345_v43 = vadd.f32 %v894_v40, %v870_v38  ;;  %545 = vadd.xlane.f32.xlu1 %v534_v39  ;;  %v516_v44 = vpop.f32.mrb[5].mxu0  ;;  %v871_v45 = vpop.f32.mrb[6].mxu1 }
 0x154   : > { %v1347_v46 = vadd.f32 %v516_v44, %v379_v41  ;;  %v895_v47 = vpop.f32.mrb[6].mxu0  ;;  %541 = vadd.xlane.f32.xlu0 %v532_v42  ;;  %v382_v48 = vpop.f32.mrb[7].mxu1 }
 0x155   : > { %v1349_v49 = vadd.f32 %v895_v47, %v871_v45  ;;  %v519_v50 = vpop.f32.mrb[7].mxu0  ;;  %v537_v54 = vmul.f32 %v1345_v43, %v1345_v43 }
 0x156   : > { %v1351_v51 = vadd.f32 %v519_v50, %v382_v48  ;;  %v535_v52 = vmul.f32 %v1347_v46, %v1347_v46 }
 0x157   : > { %v538_v55 = vmul.f32 %v1349_v49, %v1349_v49 }
 0x158   : > { %547 = vadd.xlane.f32.xlu0 %v535_v52  ;;  %v536_v53 = vmul.f32 %v1351_v51, %v1351_v51 }
 0x15a   : > { %549 = vadd.xlane.f32.xlu1 %v536_v53 }
 0x15c   : > { %551 = vadd.xlane.f32.xlu0 %v537_v54 }
 0x15e   : > { %553 = vadd.xlane.f32.xlu1 %v538_v55 }
 0x1dc   : > { %v544_v56 = vpop.xlane.xlu1 %543 }
 0x1dd   : > { %v558_v57 = vmul.f32 0.0078125, %v544_v56  ;;  %v540_v58 = vpop.xlane.xlu0 %539 }
 0x1de   : > { %v556_v59 = vmul.f32 0.0078125, %v540_v58 }
 0x1df   : > { %v566_v60 = vadd.f32 0.0001, %v558_v57 }
 0x1e0   : > { %v564_v61 = vadd.f32 0.0001, %v556_v59  ;;  %v546_v62 = vpop.xlane.xlu1 %545 }
 0x1e1   : > { %989 = vrsqrt.f32 %v566_v60  ;;  %v559_v63 = vmul.f32 0.0078125, %v546_v62  ;;  %v542_v0 = vpop.xlane.xlu0 %541 }
 0x1e2   : > { %991 = vrsqrt.f32 %v564_v61  ;;  %v557_v1 = vmul.f32 0.0078125, %v542_v0 }
 0x1e3   : > { %v567_v2 = vadd.f32 0.0001, %v559_v63 }
 0x1e4   : > { %v565_v3 = vadd.f32 0.0001, %v557_v1 }
 0x1e5   : > { %993 = vrsqrt.f32 %v567_v2  ;;  %v548_v4 = vpop.xlane.xlu0 %547 }
 0x1e6   : > { %995 = vrsqrt.f32 %v565_v3  ;;  %v560_v5 = vmul.f32 0.0078125, %v548_v4 }
 0x1e7   : > { %v550_v6 = vpop.xlane.xlu1 %549 }
 0x1e8   : > { %v568_v7 = vadd.f32 0.0001, %v560_v5  ;;  %v561_v8 = vmul.f32 0.0078125, %v550_v6 }
 0x1e9   : > { %v552_v9 = vpop.xlane.xlu0 %551 }
 0x1ea   : > { %997 = vrsqrt.f32 %v568_v7  ;;  %v569_v10 = vadd.f32 0.0001, %v561_v8  ;;  %v562_v11 = vmul.f32 0.0078125, %v552_v9 }
 0x1eb   : > { %v990_v12 = vpop.eup %989  ;;  %v554_v13 = vpop.xlane.xlu1 %553 }
 0x1ec   : > { %v992_v14 = vpop.eup %991  ;;  %999 = vrsqrt.f32 %v569_v10  ;;  %v570_v15 = vadd.f32 0.0001, %v562_v11  ;;  %v563_v16 = vmul.f32 0.0078125, %v554_v13  ;;  %v582_v17 = vmul.f32 %v990_v12, %v1329_v27 }
 0x1ed   : > { %v580_v21 = vmul.f32 %v992_v14, %v1331_v30 }
 0x1ee   : > { %1001 = vrsqrt.f32 %v570_v15  ;;  %v571_v18 = vadd.f32 0.0001, %v563_v16  ;;  %v597_v25 = vmul.f32 %v776_v20, %v582_v17 }
 0x1ef   : > { %v994_v19 = vpop.eup %993  ;;  %v595_v28 = vmul.f32 %v776_v20, %v580_v21 }
 0x1f0   : > { %v996_v22 = vpop.eup %995  ;;  %v583_v23 = vmul.f32 %v994_v19, %v1333_v33  ;;  %1003 = vrsqrt.f32 %v571_v18 }
 0x1f1   : > { %v581_v24 = vmul.f32 %v996_v22, %v1337_v36 }
 0x1f2   : > { %v598_v26 = vmul.f32 %v776_v20, %v583_v23 }
 0x1f3   : > { %v596_v27 = vmul.f32 %v776_v20, %v581_v24 }
 0x1f4   : > { %v998_v29 = vpop.eup %997  ;;  %v809_v31 = vpack.c.bf16 %v598_v26, %v597_v25 }
 0x1f5   : > { %v804_v32 = vpack.c.bf16 %v596_v27, %v595_v28  ;;  %v584_v34 = vmul.f32 %v998_v29, %v1347_v46 }
 0x1f6   : > { %v1000_v35 = vpop.eup %999  ;;  %821 = vst [vmem:[%s204_s9 + $0x8] sm:$0xff] %v809_v31  }
 0x1f7   : > { %805 = vst [vmem:[%s204_s9] sm:$0xff] %v804_v32   ;;  %v585_v30 = vmul.f32 %v1000_v35, %v1351_v51  ;;  %v599_v37 = vmul.f32 %v776_v20, %v584_v34 }
 0x1f8   : > { %v1002_v33 = vpop.eup %1001 }
 0x1f9   : > { %v600_v36 = vmul.f32 %v776_v20, %v585_v30  ;;  %v586_v38 = vmul.f32 %v1002_v33, %v1345_v43 }
 0x1fa   : > { %v1004_v39 = vpop.eup %1003 }
 0x1fb   : > { %v814_v40 = vpack.c.bf16 %v600_v36, %v599_v37  ;;  %v587_v41 = vmul.f32 %v1004_v39, %v1349_v49  ;;  %v601_v42 = vmul.f32 %v776_v20, %v586_v38 }
 0x1fd   : > { %822 = vst [vmem:[%s204_s9 + $0x10] sm:$0xff] %v814_v40   ;;  %v602_v44 = vmul.f32 %v776_v20, %v587_v41 }
 0x1ff   : > { %v819_v43 = vpack.c.bf16 %v602_v44, %v601_v42 }
 0x201   : > { %823 = vst [vmem:[%s204_s9 + $0x18] sm:$0xff] %v819_v43  }
 0x202   : > { %1076 = shalt.err (!%p1073_p7)
}
 0x203   : > { %s1077_s22 = scalar_lea.hbm %s1377_s27, 512  ;;  %s1081_s11 = scalar_lea.hbm %s1426_s3, 1024 }
 0x204   : > { %p1078_p9 = scmp.ne.s32.totalorder %s1377_s27, %s1077_s22  ;;  %p1082_p5 = scmp.lt.u32.totalorder %s1377_s27, %s1426_s3 }
 0x205   : > { %p1083_p11 = scmp.lt.u32.totalorder %s1081_s11, %s1077_s22  ;;  %p1085_p4 = scmp.lt.u32.totalorder %s1077_s22, %s1377_s27 }
 0x206   : > { %p1079_p1 = pnand %p1078_p9, %p1256_p12 }
 0x207   : > { %p1084_p2 = por %p1083_p11, %p1082_p5 }
 0x208   : > { %p1080_p0 = pneg %p1079_p1 }
 0x209   : > { %p1086_p6 = por %p1085_p4, %p1084_p2 }
 0x20b   : > { %p1087_p8 = pnand %p1086_p6, %p1080_p0 }
 0x20d   : > { %1090 = shalt.err (!%p1087_p8)
}
 0x20e   : > { %s1140_s8 = smov 64   ;;  %s1141_s9 = smov 4  }
 0x20f   : > { %910 = dma.vmem_to_hbm [thread:$0]  (%p1256_p12), %s1379_s25, 512, %s1377_s27, %s644_s28, %s1140_s8, %s1140_s8, %s1141_s9  }
 0x210 PF: > { %s672_s4 = sand.u32 1, %s1121_s12   ;;  %p1441_p10 = scmp.ne.s32.totalorder %s1431_s19, 0 }
 0x211   : > { %p1442_p13 = scmp.ge.s32.totalorder %s1133_s15, 2  ;;  %s673_s26 = scalar_lea.sflag [#allocation4], %s672_s4 }
 0x213   : > { %p921_p3 = pnand %p1442_p13, %p1441_p10 }
 0x215   : > { %1116 = dma.done.wait (!%p921_p3), %s673_s26, 512  }
 0x216   : > { %1118 = vsyncadd (!%p921_p3), %s673_s26, 4294966784  ;;  %p17_p7 = scmp.ge.s32.totalorder %s1218_s24, 4   ;;  %s1443_s12 = smov %s1125_s13 }
 0x217   : > { %s1444_s13 = smov %s1129_s14  ;;  %s1445_s14 = smov %s1252_s17 }
 0x218   : > { %s1446_s15 = smov %s1218_s24  ;;  %19 = sbr.rel (!%p17_p7) target bundleno = 6 (0x6), region = 82 }
 0x21f   :  { %678 = vsyncpa [#allocation3], 1 }
 0x220   :  { %680 = vsyncpa [#allocation3 + $0x1], 1 }
 0x221   :  { %681 = vsyncpa [#allocation6], 1 }
 0x222   :  { %682 = vsyncpa [#allocation4], 1 }
 0x223   :  { %684 = vsyncpa [#allocation4 + $0x1], 1 }

</bundles_post_ra>
